<compile_context>
chip_gen: v5e
topology: v5e:2x2
jax: 0.10.0
libtpu: 0.0.40
codegen_flags: <defaults>
</compile_context>

<pallas_src>
import jax
import jax.numpy as jnp
from jax.experimental import pallas as pl
from jax.experimental.pallas import tpu as pltpu


def _cdiv(a: int, b: int) -> int:
    return -(-a // b)


def _round_up(x: int, m: int) -> int:
    return ((x + m - 1) // m) * m


def _choose_tile_m(M: int, target: int) -> int:
    """Row-tile size: big slabs, MXU-friendly multiples, >=2 steps for big M."""
    n_tiles = _cdiv(M, target)
    if n_tiles == 1 and M > 256:
        n_tiles = 2                      # give v7x's two TensorCores work
    tile_m = _round_up(_cdiv(M, n_tiles), 8)
    if tile_m >= 256:
        tile_m = _round_up(tile_m, 256)  # v6e/v7x MXU tiles are 256x256
    elif tile_m >= 128:
        tile_m = _round_up(tile_m, 128)  # v5e MXU tiles are 128x128
    return tile_m


def _head_kernel(x_ref, w1_ref, b1_ref, w2_ref, b2_ref, o_ref):
    # x_ref:  (tile_m, 2H)   bf16     w1_ref: (2H, H_pad)    bf16
    # b1_ref: (1, H_pad)     f32      w2_ref: (H_pad, N_pad) bf16
    # b2_ref: (1, N_pad)     f32      o_ref:  (tile_m, N_pad)
    h = jnp.dot(x_ref[...], w1_ref[...], preferred_element_type=jnp.float32)
    h = jnp.tanh(h + b1_ref[...])          # bias + tanh on the f32 acc (VPU/EUP)
    h = h.astype(w2_ref.dtype)             # bf16 back into the MXU
    o = jnp.dot(h, w2_ref[...], preferred_element_type=jnp.float32)
    o = o + b2_ref[...]
    o_ref[...] = o.astype(o_ref.dtype)


def roberta_classification_head(x, w1, b1, w2, b2, *,
                                compute_dtype=jnp.bfloat16,
                                tile_m_target=512):
    """x: (..., hidden). Reshape / pad / cast glue in JAX; matmuls+tanh in Pallas."""
    hidden = x.shape[-1]
    x2 = x.reshape(-1, hidden * 2)                       # (M, 2H), no copy
    M, in_dim = x2.shape
    assert in_dim == w1.shape[0], "dense weight must be (2*hidden, hidden)"
    H = w1.shape[1]
    num_labels = w2.shape[1]
    out_dtype = x.dtype

    # --- lane-dense padding of the hidden / label dims (no-op if already 128k) ---
    H_pad = _round_up(H, 128)
    n_pad = _round_up(max(num_labels, 128), 128)
    w1p = jnp.pad(w1, ((0, 0), (0, H_pad - H))) if H_pad != H else w1
    b1p = jnp.pad(b1.reshape(1, H), ((0, 0), (0, H_pad - H)))
    w2p = jnp.pad(w2, ((0, H_pad - H), (0, n_pad - num_labels)))
    b2p = jnp.pad(b2.reshape(1, num_labels), ((0, 0), (0, n_pad - num_labels)))

    # --- bf16 MXU inputs, f32 bias/accumulator ----------------------------------
    x2c = x2.astype(compute_dtype)
    w1c = w1p.astype(compute_dtype)
    w2c = w2p.astype(compute_dtype)
    b1c = b1p.astype(jnp.float32)
    b2c = b2p.astype(jnp.float32)

    # --- row tiling: no activation padding, ragged last block handled by Pallas --
    tile_m = _choose_tile_m(M, tile_m_target)
    grid = (_cdiv(M, tile_m),)

    itm_c = x2c.dtype.itemsize
    itm_o = jnp.zeros((), out_dtype).dtype.itemsize

    # Only raise the scoped-VMEM limit if the tile budget needs it (headroom on
    # v7x's 64 MiB physical VMEM; v5e/v6e have 128 MiB).
    est_vmem = (2 * tile_m * in_dim * itm_c          # x slab (double-buffered)
                + 2 * in_dim * H_pad * itm_c         # w1 (worst case 2 buffers)
                + 2 * H_pad * n_pad * itm_c          # w2
                + 2 * (H_pad + n_pad) * 4            # biases
                + 2 * tile_m * n_pad * itm_o         # out slab (double-buffered)
                + tile_m * H_pad * 4                 # f32 intermediate h
                + tile_m * n_pad * 4)                # f32 accumulator
    vmem_limit = None
    if est_vmem > 30 * 1024 * 1024:
        vmem_limit = min(int(est_vmem * 1.25), 56 * 1024 * 1024)

    cost = pl.CostEstimate(
        flops=2 * M * in_dim * H_pad + 2 * M * H_pad * n_pad,
        transcendentals=M * H_pad,
        bytes_accessed=(M * in_dim * itm_c + in_dim * H_pad * itm_c
                        + H_pad * 4 + H_pad * n_pad * itm_c + n_pad * 4
                        + M * n_pad * itm_o),
    )

    def _run(single_buffer_weights: bool):
        # Constant index_maps keep weights/biases VMEM-resident (one DMA);
        # Buffered(1) avoids wasting VMEM on a useless second weight buffer.
        const_kw = {"pipeline_mode": pl.Buffered(1)} if single_buffer_weights else {}
        in_specs = [
            # x: one tile_m-row slab per grid step (pipelined HBM->VMEM DMA).
            pl.BlockSpec((tile_m, in_dim), lambda i: (i, 0)),
            pl.BlockSpec((in_dim, H_pad), lambda i: (0, 0), **const_kw),
            pl.BlockSpec((1, H_pad), lambda i: (0, 0), **const_kw),
            pl.BlockSpec((H_pad, n_pad), lambda i: (0, 0), **const_kw),
            pl.BlockSpec((1, n_pad), lambda i: (0, 0), **const_kw),
        ]
        return pl.pallas_call(
            _head_kernel,
            out_shape=jax.ShapeDtypeStruct((M, n_pad), out_dtype),
            grid=grid,
            in_specs=in_specs,
            out_specs=pl.BlockSpec((tile_m, n_pad), lambda i: (i, 0)),
            compiler_params=pltpu.CompilerParams(
                dimension_semantics=("parallel",),
                vmem_limit_bytes=vmem_limit,
            ),
            cost_estimate=cost,
        )(x2c, w1c, b1c, w2c, b2c)

    try:
        out = _run(True)
    except Exception:
        # Fallback if this JAX version does not accept pipeline_mode=Buffered(1)
        # on top-level pallas_call BlockSpecs; the default double-buffers weights.
        out = _run(False)

    # Strip the lane padding of the 2-wide projection.
    return out[:, :num_labels]


def reference(x, w1, b1, w2, b2):
    hidden = x.shape[-1]
    x2 = x.reshape(-1, hidden * 2)
    h = jnp.tanh(x2 @ w1 + b1)
    return h @ w2 + b2


if __name__ == "__main__":
    key = jax.random.PRNGKey(0)
    k_x, k_w1, k_b1, k_w2, k_b2 = jax.random.split(key, 5)

    batch, seq, hidden = 2, 8, 32      # small config.hidden_size = 32
    num_labels = 2

    x = jax.random.normal(k_x, (batch, seq, hidden), dtype=jnp.float32)

    # Parameters for Linear(2H -> H) and Linear(H -> 2),
    # stored as (in_features, out_features).
    w1 = jax.random.normal(k_w1, (hidden * 2, hidden), dtype=jnp.float32) * 0.02
    b1 = jax.random.normal(k_b1, (hidden,), dtype=jnp.float32) * 0.02
    w2 = jax.random.normal(k_w2, (hidden, num_labels), dtype=jnp.float32) * 0.02
    b2 = jax.random.normal(k_b2, (num_labels,), dtype=jnp.float32) * 0.02

    out = roberta_classification_head(x, w1, b1, w2, b2)
    out = jax.block_until_ready(out)

    ref = reference(x, w1, b1, w2, b2)
    M = (batch * seq * hidden) // (hidden * 2)
    assert out.shape == (M, num_labels), f"bad shape {out.shape}"
    # bf16 MXU inputs -> compare against the f32 reference at bf16-level tolerance.
    assert jnp.allclose(out, ref, atol=2e-2, rtol=2e-2), "mismatch vs reference"

    print("KERNEL_OK")
</pallas_src>

<mosaic_0001>
module attributes {stable_mosaic.version = 11 : i64} {
  func.func @_head_kernel(%arg0: i32, %arg1: memref<8x64xbf16, #tpu.memory_space<vmem>>, %arg2: memref<64x128xbf16, #tpu.memory_space<vmem>>, %arg3: memref<1x128xf32, #tpu.memory_space<vmem>>, %arg4: memref<128x128xbf16, #tpu.memory_space<vmem>>, %arg5: memref<1x128xf32, #tpu.memory_space<vmem>>, %arg6: memref<8x128xf32, #tpu.memory_space<vmem>>) attributes {dimension_semantics = [#tpu.dimension_semantics<parallel>], iteration_bounds = array<i64: 1>, scalar_prefetch = 0 : i64, scratch_operands = 0 : i64, tpu.core_type = #tpu.core_type<tc>, window_params = [{transform_indices = @transform_0, window_bounds = array<i64: 8, 64>}, {pipeline_mode = #tpu.pipeline_mode<synchronous>, transform_indices = @transform_1, window_bounds = array<i64: 64, 128>}, {pipeline_mode = #tpu.pipeline_mode<synchronous>, transform_indices = @transform_2, window_bounds = array<i64: 1, 128>}, {pipeline_mode = #tpu.pipeline_mode<synchronous>, transform_indices = @transform_3, window_bounds = array<i64: 128, 128>}, {pipeline_mode = #tpu.pipeline_mode<synchronous>, transform_indices = @transform_4, window_bounds = array<i64: 1, 128>}, {transform_indices = @transform_5, window_bounds = array<i64: 8, 128>}]} {
    %c0 = arith.constant 0 : index
    %c0_0 = arith.constant 0 : index
    %0 = vector.load %arg1[%c0, %c0_0] : memref<8x64xbf16, #tpu.memory_space<vmem>>, vector<8x64xbf16>
    %c0_1 = arith.constant 0 : index
    %c0_2 = arith.constant 0 : index
    %1 = vector.load %arg2[%c0_1, %c0_2] : memref<64x128xbf16, #tpu.memory_space<vmem>>, vector<64x128xbf16>
    %cst = arith.constant dense<0.000000e+00> : vector<8x128xf32>
    %2 = tpu.matmul %0, %1, %cst {dimension_numbers = #tpu.dot_dimension_numbers<[1], [0], [0], [1], [0, 0, 1, 1], [], []>} : vector<8x64xbf16>, vector<64x128xbf16>, vector<8x128xf32> -> vector<8x128xf32>
    %c0_3 = arith.constant 0 : index
    %c0_4 = arith.constant 0 : index
    %3 = vector.load %arg3[%c0_3, %c0_4] : memref<1x128xf32, #tpu.memory_space<vmem>>, vector<1x128xf32>
    %4 = vector.broadcast %3 : vector<1x128xf32> to vector<8x128xf32>
    %5 = arith.addf %2, %4 : vector<8x128xf32>
    %6 = math.tanh %5 : vector<8x128xf32>
    %7 = arith.truncf %6 : vector<8x128xf32> to vector<8x128xbf16>
    %c0_5 = arith.constant 0 : index
    %c0_6 = arith.constant 0 : index
    %8 = vector.load %arg4[%c0_5, %c0_6] : memref<128x128xbf16, #tpu.memory_space<vmem>>, vector<128x128xbf16>
    %cst_7 = arith.constant dense<0.000000e+00> : vector<8x128xf32>
    %9 = tpu.matmul %7, %8, %cst_7 {dimension_numbers = #tpu.dot_dimension_numbers<[1], [0], [0], [1], [0, 0, 1, 1], [], []>} : vector<8x128xbf16>, vector<128x128xbf16>, vector<8x128xf32> -> vector<8x128xf32>
    %c0_8 = arith.constant 0 : index
    %c0_9 = arith.constant 0 : index
    %10 = vector.load %arg5[%c0_8, %c0_9] : memref<1x128xf32, #tpu.memory_space<vmem>>, vector<1x128xf32>
    %11 = vector.broadcast %10 : vector<1x128xf32> to vector<8x128xf32>
    %12 = arith.addf %9, %11 : vector<8x128xf32>
    %c0_10 = arith.constant 0 : index
    %c0_11 = arith.constant 0 : index
    %13 = vector.load %arg6[%c0_10, %c0_11] : memref<8x128xf32, #tpu.memory_space<vmem>>, vector<8x128xf32>
    tpu.vector_store %arg6[%c0_10, %c0_11], %12 {strides = array<i32>} : memref<8x128xf32, #tpu.memory_space<vmem>>, vector<8x128xf32>,
    return
  }
  func.func @transform_0(%arg0: i32) -> (i32, i32) {
    %c0_i32 = arith.constant 0 : i32
    %c0_i32_0 = arith.constant 0 : i32
    return %arg0, %c0_i32 : i32, i32
  }
  func.func @transform_1(%arg0: i32) -> (i32, i32) {
    %c0_i32 = arith.constant 0 : i32
    %c0_i32_0 = arith.constant 0 : i32
    %c0_i32_1 = arith.constant 0 : i32
    return %c0_i32, %c0_i32_0 : i32, i32
  }
  func.func @transform_2(%arg0: i32) -> (i32, i32) {
    %c0_i32 = arith.constant 0 : i32
    %c0_i32_0 = arith.constant 0 : i32
    %c0_i32_1 = arith.constant 0 : i32
    return %c0_i32, %c0_i32_0 : i32, i32
  }
  func.func @transform_3(%arg0: i32) -> (i32, i32) {
    %c0_i32 = arith.constant 0 : i32
    %c0_i32_0 = arith.constant 0 : i32
    %c0_i32_1 = arith.constant 0 : i32
    return %c0_i32, %c0_i32_0 : i32, i32
  }
  func.func @transform_4(%arg0: i32) -> (i32, i32) {
    %c0_i32 = arith.constant 0 : i32
    %c0_i32_0 = arith.constant 0 : i32
    %c0_i32_1 = arith.constant 0 : i32
    return %c0_i32, %c0_i32_0 : i32, i32
  }
  func.func @transform_5(%arg0: i32) -> (i32, i32) {
    %c0_i32 = arith.constant 0 : i32
    %c0_i32_0 = arith.constant 0 : i32
    return %arg0, %c0_i32 : i32, i32
  }
}

module attributes {stable_mosaic.version = 11 : i64} {
  func.func @_head_kernel(%arg0: i32, %arg1: memref<8x64xbf16, #tpu.memory_space<vmem>>, %arg2: memref<64x128xbf16, #tpu.memory_space<vmem>>, %arg3: memref<1x128xf32, #tpu.memory_space<vmem>>, %arg4: memref<128x128xbf16, #tpu.memory_space<vmem>>, %arg5: memref<1x128xf32, #tpu.memory_space<vmem>>, %arg6: memref<8x128xf32, #tpu.memory_space<vmem>>) attributes {dimension_semantics = [#tpu.dimension_semantics<parallel>], iteration_bounds = array<i64: 1>, scalar_prefetch = 0 : i64, scratch_operands = 0 : i64, tpu.core_type = #tpu.core_type<tc>, window_params = [{transform_indices = @transform_0, window_bounds = array<i64: 8, 64>}, {pipeline_mode = #tpu.pipeline_mode<synchronous>, transform_indices = @transform_1, window_bounds = array<i64: 64, 128>}, {pipeline_mode = #tpu.pipeline_mode<synchronous>, transform_indices = @transform_2, window_bounds = array<i64: 1, 128>}, {pipeline_mode = #tpu.pipeline_mode<synchronous>, transform_indices = @transform_3, window_bounds = array<i64: 128, 128>}, {pipeline_mode = #tpu.pipeline_mode<synchronous>, transform_indices = @transform_4, window_bounds = array<i64: 1, 128>}, {transform_indices = @transform_5, window_bounds = array<i64: 8, 128>}]} {
    %c0 = arith.constant 0 : index
    %c0_0 = arith.constant 0 : index
    %0 = vector.load %arg1[%c0, %c0_0] : memref<8x64xbf16, #tpu.memory_space<vmem>>, vector<8x64xbf16>
    %c0_1 = arith.constant 0 : index
    %c0_2 = arith.constant 0 : index
    %1 = vector.load %arg2[%c0_1, %c0_2] : memref<64x128xbf16, #tpu.memory_space<vmem>>, vector<64x128xbf16>
    %cst = arith.constant dense<0.000000e+00> : vector<8x128xf32>
    %2 = tpu.matmul %0, %1, %cst {dimension_numbers = #tpu.dot_dimension_numbers<[1], [0], [0], [1], [0, 0, 1, 1], [], []>} : vector<8x64xbf16>, vector<64x128xbf16>, vector<8x128xf32> -> vector<8x128xf32>
    %c0_3 = arith.constant 0 : index
    %c0_4 = arith.constant 0 : index
    %3 = vector.load %arg3[%c0_3, %c0_4] : memref<1x128xf32, #tpu.memory_space<vmem>>, vector<1x128xf32>
    %4 = vector.broadcast %3 : vector<1x128xf32> to vector<8x128xf32>
    %5 = arith.addf %2, %4 : vector<8x128xf32>
    %6 = math.tanh %5 : vector<8x128xf32>
    %7 = arith.truncf %6 : vector<8x128xf32> to vector<8x128xbf16>
    %c0_5 = arith.constant 0 : index
    %c0_6 = arith.constant 0 : index
    %8 = vector.load %arg4[%c0_5, %c0_6] : memref<128x128xbf16, #tpu.memory_space<vmem>>, vector<128x128xbf16>
    %cst_7 = arith.constant dense<0.000000e+00> : vector<8x128xf32>
    %9 = tpu.matmul %7, %8, %cst_7 {dimension_numbers = #tpu.dot_dimension_numbers<[1], [0], [0], [1], [0, 0, 1, 1], [], []>} : vector<8x128xbf16>, vector<128x128xbf16>, vector<8x128xf32> -> vector<8x128xf32>
    %c0_8 = arith.constant 0 : index
    %c0_9 = arith.constant 0 : index
    %10 = vector.load %arg5[%c0_8, %c0_9] : memref<1x128xf32, #tpu.memory_space<vmem>>, vector<1x128xf32>
    %11 = vector.broadcast %10 : vector<1x128xf32> to vector<8x128xf32>
    %12 = arith.addf %9, %11 : vector<8x128xf32>
    %c0_10 = arith.constant 0 : index
    %c0_11 = arith.constant 0 : index
    %13 = vector.load %arg6[%c0_10, %c0_11] : memref<8x128xf32, #tpu.memory_space<vmem>>, vector<8x128xf32>
    tpu.vector_store %arg6[%c0_10, %c0_11], %12 {strides = array<i32>} : memref<8x128xf32, #tpu.memory_space<vmem>>, vector<8x128xf32>,
    return
  }
  func.func @transform_0(%arg0: i32) -> (i32, i32) {
    %c0_i32 = arith.constant 0 : i32
    %c0_i32_0 = arith.constant 0 : i32
    return %arg0, %c0_i32 : i32, i32
  }
  func.func @transform_1(%arg0: i32) -> (i32, i32) {
    %c0_i32 = arith.constant 0 : i32
    %c0_i32_0 = arith.constant 0 : i32
    %c0_i32_1 = arith.constant 0 : i32
    return %c0_i32, %c0_i32_0 : i32, i32
  }
  func.func @transform_2(%arg0: i32) -> (i32, i32) {
    %c0_i32 = arith.constant 0 : i32
    %c0_i32_0 = arith.constant 0 : i32
    %c0_i32_1 = arith.constant 0 : i32
    return %c0_i32, %c0_i32_0 : i32, i32
  }
  func.func @transform_3(%arg0: i32) -> (i32, i32) {
    %c0_i32 = arith.constant 0 : i32
    %c0_i32_0 = arith.constant 0 : i32
    %c0_i32_1 = arith.constant 0 : i32
    return %c0_i32, %c0_i32_0 : i32, i32
  }
  func.func @transform_4(%arg0: i32) -> (i32, i32) {
    %c0_i32 = arith.constant 0 : i32
    %c0_i32_0 = arith.constant 0 : i32
    %c0_i32_1 = arith.constant 0 : i32
    return %c0_i32, %c0_i32_0 : i32, i32
  }
  func.func @transform_5(%arg0: i32) -> (i32, i32) {
    %c0_i32 = arith.constant 0 : i32
    %c0_i32_0 = arith.constant 0 : i32
    return %arg0, %c0_i32 : i32, i32
  }
}

</mosaic_0001>

<bundles_post_ra>
// kernel: tpu_custom_call.1
= control target key start
LH: loop header
LB: loop body
LE: loop exit
PB: predicated region body
PF: predicated region fallthrough
CT: control target
= control target key end

     0   :  { %10 = vsyncpa [#allocation3], 0  ;;  %s450_s0 = inlined_call_operand.hbm [shape: bf16[8,64], index: 0, kind: input, shape index: {}]   ;;  %s451_s1 = inlined_call_operand.hbm [shape: bf16[64,128], index: 1, kind: input, shape index: {}]   ;;  %s452_s2 = inlined_call_operand.vmem [shape: f32[1,128], index: 2, kind: input, shape index: {}]   ;;  %s453_s3 = inlined_call_operand.hbm [shape: bf16[128,128], index: 3, kind: input, shape index: {}]   ;;  %s454_s4 = inlined_call_operand.vmem [shape: f32[1,128], index: 4, kind: input, shape index: {}]   ;;  %s455_s5 = inlined_call_operand.hbm [shape: f32[8,128], index: 5, kind: output, shape index: {}]  }
   0x1   :  { %11 = vsyncpa [#allocation6], 0  ;;  %s28_s20 = sshll.u32 %s451_s1, 4  ;;  %s29_s20 = int_to_ptr.hbm [resolvable:$true] %s28_s20 }
   0x2   :  { %12 = vsyncpa [#allocation4], 0  ;;  %s396_s21 = smov [#allocation5]   ;;  %s18_s25 = sshll.u32 %s450_s0, 4  ;;  %s19_s25 = int_to_ptr.hbm [resolvable:$true] %s18_s25 }
   0x3   :  { %s30_s22 = sshll.u32 %s396_s21, 4  ;;  %s397_s26 = smov 64   ;;  %s31_s22 = int_to_ptr.vmem [resolvable:$true] %s30_s22 }
   0x4   :  { %s398_s27 = smov 4   ;;  %s399_s28 = smov [#allocation2]  }
   0x5   :  { %36 = dma.hbm_to_vmem [thread:$0]  %s29_s20, 512, %s31_s22, [#allocation6], %s397_s26, %s397_s26, %s398_s27  }
   0x6   :  { %s20_s29 = sshll.u32 %s399_s28, 4  ;;  %s43_s7 = sshll.u32 %s453_s3, 4  ;;  %s21_s29 = int_to_ptr.vmem [resolvable:$true] %s20_s29  ;;  %s44_s7 = int_to_ptr.hbm [resolvable:$true] %s43_s7 }
   0x7   :  { %23 = dma.hbm_to_vmem [thread:$0]  %s19_s25, 64, %s21_s29, [#allocation3]  }
   0x8   :  { %s400_s1 = smov [#allocation7]  }
   0x9   :  { %s45_s8 = sshll.u32 %s400_s1, 4  ;;  %s46_s8 = int_to_ptr.vmem [resolvable:$true] %s45_s8 }
   0xa   :  { %51 = dma.hbm_to_vmem [thread:$0]  %s44_s7, 1024, %s46_s8, [#allocation6], %s397_s26, %s397_s26, %s398_s27  }
   0xb   :  { %390 = dma.done.wait [#allocation3], 64  }
   0xc   :  { %391 = vsyncadd [#allocation3], 4294967232 }
   0xd   :  { %392 = dma.done.wait [#allocation6], 1536  }
   0xe   :  { %393 = vsyncadd [#allocation6], 4294965760  ;;  %v275_v0 = vld [vmem:[#allocation5 + $0x18] sm:$0xff]  ;;  %v274_v2 = vld [vmem:[#allocation5 + $0x10] sm:$0xff]  ;;  %vm104_vm0 = vcmask 523264   ;;  %s401_s11 = smov [#allocation8]  }
   0xf   :  { %v283_v1 = vld [vmem:[#allocation7 + $0x38] sm:$0xff]  ;;  %112 = vmatpush.bf16.msra.mxu0 %v275_v0  ;;  %v282_v3 = vld [vmem:[#allocation7 + $0x30] sm:$0xff]  ;;  %v273_v4 = vld [vmem:[#allocation5 + $0x8] sm:$0xff]  ;;  %s210_s12 = sshll.u32 %s401_s11, 4  ;;  %s212_s15 = sshll.u32 %s455_s5, 4  ;;  %s211_s12 = int_to_ptr.vmem [resolvable:$true] %s210_s12  ;;  %s213_s15 = int_to_ptr.hbm [resolvable:$true] %s212_s15 }
  0x10   :  { %191 = vmatpush.bf16.msra.mxu1 %v283_v1  ;;  %v281_v5 = vld [vmem:[#allocation7 + $0x28] sm:$0xff]  ;;  %v272_v6 = vld [vmem:[#allocation5] sm:$0xff]  ;;  %v67_v8 = vld [vmem:[#allocation2] sm:$0xf] }
  0x11   :  { %v280_v7 = vld [vmem:[#allocation7 + $0x20] sm:$0xff]  ;;  %v279_v9 = vld [vmem:[#allocation7 + $0x18] sm:$0xff]  ;;  %v278_v10 = vld [vmem:[#allocation7 + $0x10] sm:$0xff] }
  0x12   :  { %v277_v11 = vld [vmem:[#allocation7 + $0x8] sm:$0xff]  ;;  %v276_v12 = vld [vmem:[#allocation7] sm:$0xff]  ;;  %v290_v13 = vld [vmem:[%s452_s2] ss:$0 sm:$0xff] }
  0x13   :  { %113 = vmatpush.bf16.msra.mxu0 %v274_v2  ;;  %v291_v19 = vld [vmem:[%s454_s4] ss:$0 sm:$0xff] }
  0x14   :  { %192 = vmatpush.bf16.msra.mxu1 %v282_v3 }
  0x17   :  { %114 = vmatpush.bf16.msra.mxu0 %v273_v4 }
  0x18   :  { %193 = vmatpush.bf16.msra.mxu1 %v281_v5 }
  0x1b   :  { %115 = vmatpush.bf16.msra.mxu0 %v272_v6 }
  0x1c   :  { %194 = vmatpush.bf16.msra.mxu1 %v280_v7 }
  0x1e   :  { %239 = vmatmul.msk.bf16.vlgmr.msra.gmra.mxu0 %vm104_vm0, %v67_v8 }
  0x20   :  { %195 = vmatpush.bf16.msra.mxu1 %v279_v9 }
  0x24   :  { %196 = vmatpush.bf16.msra.mxu1 %v278_v10 }
  0x28   :  { %197 = vmatpush.bf16.msra.mxu1 %v277_v11 }
  0x2c   :  { %198 = vmatpush.bf16.msra.mxu1 %v276_v12 }
  0x9b   :  { %v117_v14 = vpop.f32.mrf.mxu0 }
  0x9c   :  { %v118_v15 = vadd.f32 %v290_v13, %v117_v14 }
  0x9e   :  { %292 = vtanh.f32 %v118_v15 }
  0xa3   :  { %v119_v16 = vpop.f32.mrf.mxu0 }
  0xa4   :  { %v293_v17 = vpop.eup %292 }
  0xa5   :  { %v122_v18 = vpack.c.bf16 %v293_v17, %v293_v17 }
  0xa7   :  { %199 = vmatmul.bf16.vlgmr.msra.gmra.mxu1 %v122_v18 }
 0x124   :  { %v200_v20 = vpop.f32.mrf.mxu1 }
 0x125   :  { %v201_v21 = vadd.f32 %v291_v19, %v200_v20 }
 0x127   :  { %204 = vst [vmem:[#allocation8] sm:$0xff] %v201_v21 }
 0x128   :  { %215 = dma.vmem_to_hbm [thread:$0]  %s211_s12, 128, %s213_s15, [#allocation4]  }
 0x12c   :  { %v202_v22 = vpop.f32.mrf.mxu1 }
 0x12d   :  { %394 = dma.done.wait [#allocation4], 128  }
 0x12e   :  { %395 = vsyncadd [#allocation4], 4294967168 }
 0x12f   :  { %220 = vsyncpa [#allocation3], 1 }
 0x130   :  { %221 = vsyncpa [#allocation6], 1 }
 0x131   :  { %222 = vsyncpa [#allocation4], 1 }

// kernel: tpu_custom_call.1
= control target key start
LH: loop header
LB: loop body
LE: loop exit
PB: predicated region body
PF: predicated region fallthrough
CT: control target
= control target key end

     0   :  { %10 = vsyncpa [#allocation3], 0  ;;  %s450_s0 = inlined_call_operand.hbm [shape: bf16[8,64], index: 0, kind: input, shape index: {}]   ;;  %s451_s1 = inlined_call_operand.hbm [shape: bf16[64,128], index: 1, kind: input, shape index: {}]   ;;  %s452_s2 = inlined_call_operand.vmem [shape: f32[1,128], index: 2, kind: input, shape index: {}]   ;;  %s453_s3 = inlined_call_operand.hbm [shape: bf16[128,128], index: 3, kind: input, shape index: {}]   ;;  %s454_s4 = inlined_call_operand.vmem [shape: f32[1,128], index: 4, kind: input, shape index: {}]   ;;  %s455_s5 = inlined_call_operand.hbm [shape: f32[8,128], index: 5, kind: output, shape index: {}]  }
   0x1   :  { %11 = vsyncpa [#allocation6], 0  ;;  %s28_s20 = sshll.u32 %s451_s1, 4  ;;  %s29_s20 = int_to_ptr.hbm [resolvable:$true] %s28_s20 }
   0x2   :  { %12 = vsyncpa [#allocation4], 0  ;;  %s396_s21 = smov [#allocation5]   ;;  %s18_s25 = sshll.u32 %s450_s0, 4  ;;  %s19_s25 = int_to_ptr.hbm [resolvable:$true] %s18_s25 }
   0x3   :  { %s30_s22 = sshll.u32 %s396_s21, 4  ;;  %s397_s26 = smov 64   ;;  %s31_s22 = int_to_ptr.vmem [resolvable:$true] %s30_s22 }
   0x4   :  { %s398_s27 = smov 4   ;;  %s399_s28 = smov [#allocation2]  }
   0x5   :  { %36 = dma.hbm_to_vmem [thread:$0]  %s29_s20, 512, %s31_s22, [#allocation6], %s397_s26, %s397_s26, %s398_s27  }
   0x6   :  { %s20_s29 = sshll.u32 %s399_s28, 4  ;;  %s43_s7 = sshll.u32 %s453_s3, 4  ;;  %s21_s29 = int_to_ptr.vmem [resolvable:$true] %s20_s29  ;;  %s44_s7 = int_to_ptr.hbm [resolvable:$true] %s43_s7 }
   0x7   :  { %23 = dma.hbm_to_vmem [thread:$0]  %s19_s25, 64, %s21_s29, [#allocation3]  }
   0x8   :  { %s400_s1 = smov [#allocation7]  }
   0x9   :  { %s45_s8 = sshll.u32 %s400_s1, 4  ;;  %s46_s8 = int_to_ptr.vmem [resolvable:$true] %s45_s8 }
   0xa   :  { %51 = dma.hbm_to_vmem [thread:$0]  %s44_s7, 1024, %s46_s8, [#allocation6], %s397_s26, %s397_s26, %s398_s27  }
   0xb   :  { %390 = dma.done.wait [#allocation3], 64  }
   0xc   :  { %391 = vsyncadd [#allocation3], 4294967232 }
   0xd   :  { %392 = dma.done.wait [#allocation6], 1536  }
   0xe   :  { %393 = vsyncadd [#allocation6], 4294965760  ;;  %v275_v0 = vld [vmem:[#allocation5 + $0x18] sm:$0xff]  ;;  %v274_v2 = vld [vmem:[#allocation5 + $0x10] sm:$0xff]  ;;  %vm104_vm0 = vcmask 523264   ;;  %s401_s11 = smov [#allocation8]  }
   0xf   :  { %v283_v1 = vld [vmem:[#allocation7 + $0x38] sm:$0xff]  ;;  %112 = vmatpush.bf16.msra.mxu0 %v275_v0  ;;  %v282_v3 = vld [vmem:[#allocation7 + $0x30] sm:$0xff]  ;;  %v273_v4 = vld [vmem:[#allocation5 + $0x8] sm:$0xff]  ;;  %s210_s12 = sshll.u32 %s401_s11, 4  ;;  %s212_s15 = sshll.u32 %s455_s5, 4  ;;  %s211_s12 = int_to_ptr.vmem [resolvable:$true] %s210_s12  ;;  %s213_s15 = int_to_ptr.hbm [resolvable:$true] %s212_s15 }
  0x10   :  { %191 = vmatpush.bf16.msra.mxu1 %v283_v1  ;;  %v281_v5 = vld [vmem:[#allocation7 + $0x28] sm:$0xff]  ;;  %v272_v6 = vld [vmem:[#allocation5] sm:$0xff]  ;;  %v67_v8 = vld [vmem:[#allocation2] sm:$0xf] }
  0x11   :  { %v280_v7 = vld [vmem:[#allocation7 + $0x20] sm:$0xff]  ;;  %v279_v9 = vld [vmem:[#allocation7 + $0x18] sm:$0xff]  ;;  %v278_v10 = vld [vmem:[#allocation7 + $0x10] sm:$0xff] }
  0x12   :  { %v277_v11 = vld [vmem:[#allocation7 + $0x8] sm:$0xff]  ;;  %v276_v12 = vld [vmem:[#allocation7] sm:$0xff]  ;;  %v290_v13 = vld [vmem:[%s452_s2] ss:$0 sm:$0xff] }
  0x13   :  { %113 = vmatpush.bf16.msra.mxu0 %v274_v2  ;;  %v291_v19 = vld [vmem:[%s454_s4] ss:$0 sm:$0xff] }
  0x14   :  { %192 = vmatpush.bf16.msra.mxu1 %v282_v3 }
  0x17   :  { %114 = vmatpush.bf16.msra.mxu0 %v273_v4 }
  0x18   :  { %193 = vmatpush.bf16.msra.mxu1 %v281_v5 }
  0x1b   :  { %115 = vmatpush.bf16.msra.mxu0 %v272_v6 }
  0x1c   :  { %194 = vmatpush.bf16.msra.mxu1 %v280_v7 }
  0x1e   :  { %239 = vmatmul.msk.bf16.vlgmr.msra.gmra.mxu0 %vm104_vm0, %v67_v8 }
  0x20   :  { %195 = vmatpush.bf16.msra.mxu1 %v279_v9 }
  0x24   :  { %196 = vmatpush.bf16.msra.mxu1 %v278_v10 }
  0x28   :  { %197 = vmatpush.bf16.msra.mxu1 %v277_v11 }
  0x2c   :  { %198 = vmatpush.bf16.msra.mxu1 %v276_v12 }
  0x9b   :  { %v117_v14 = vpop.f32.mrf.mxu0 }
  0x9c   :  { %v118_v15 = vadd.f32 %v290_v13, %v117_v14 }
  0x9e   :  { %292 = vtanh.f32 %v118_v15 }
  0xa3   :  { %v119_v16 = vpop.f32.mrf.mxu0 }
  0xa4   :  { %v293_v17 = vpop.eup %292 }
  0xa5   :  { %v122_v18 = vpack.c.bf16 %v293_v17, %v293_v17 }
  0xa7   :  { %199 = vmatmul.bf16.vlgmr.msra.gmra.mxu1 %v122_v18 }
 0x124   :  { %v200_v20 = vpop.f32.mrf.mxu1 }
 0x125   :  { %v201_v21 = vadd.f32 %v291_v19, %v200_v20 }
 0x127   :  { %204 = vst [vmem:[#allocation8] sm:$0xff] %v201_v21 }
 0x128   :  { %215 = dma.vmem_to_hbm [thread:$0]  %s211_s12, 128, %s213_s15, [#allocation4]  }
 0x12c   :  { %v202_v22 = vpop.f32.mrf.mxu1 }
 0x12d   :  { %394 = dma.done.wait [#allocation4], 128  }
 0x12e   :  { %395 = vsyncadd [#allocation4], 4294967168 }
 0x12f   :  { %220 = vsyncpa [#allocation3], 1 }
 0x130   :  { %221 = vsyncpa [#allocation6], 1 }
 0x131   :  { %222 = vsyncpa [#allocation4], 1 }

</bundles_post_ra>
